<compile_context>
chip_gen: v7x
topology: tpu7x:2x2x1
jax: 0.10.0
libtpu: 0.0.40
codegen_flags: <defaults>
</compile_context>

<pallas_src>
import math

import jax
import jax.numpy as jnp
import numpy as np
from jax.experimental import pallas as pl
from jax.experimental.pallas import tpu as pltpu


def rope_kernel(x_ref, cos_ref, sin_ref, o_ref):
    """out = x * cos_e + pair_swap(x) * sin_signed, all blocks (tR, W)."""
    x = x_ref[...].astype(jnp.float32)
    c = cos_ref[...].astype(jnp.float32)   # cos expanded to full width
    s = sin_ref[...].astype(jnp.float32)   # sin expanded, sign folded (-s at even lanes)

    w = x.shape[-1]
    lane = jax.lax.broadcasted_iota(jnp.int32, x.shape, dimension=x.ndim - 1)
    is_even = jnp.bitwise_and(lane, 1) == 0

    # np.roll semantics: roll(x, k)[d] = x[(d - k) % w]
    x_next = pltpu.roll(x, w - 1, x.ndim - 1)   # x_next[..., d] = x[..., (d + 1) % w]
    x_prev = pltpu.roll(x, 1, x.ndim - 1)       # x_prev[..., d] = x[..., (d - 1) % w]
    # Even lanes never need the wrapped element (d+1 <= w-1), odd lanes never d-1 < 0,
    # and D is even so pairs never straddle a folded-row boundary.
    x_swap = jnp.where(is_even, x_next, x_prev)

    o_ref[...] = (x * c + x_swap * s).astype(o_ref.dtype)


def make_rope_buffers(theta: float, d_k: int, max_seq_len: int):
    """Deterministic sin/cos tables, identical to the PyTorch __init__."""
    positions = jnp.arange(max_seq_len, dtype=jnp.float32)[:, None]       # (L, 1)
    block_indices = jnp.arange(d_k // 2, dtype=jnp.float32)[None, :]      # (1, D/2)
    exponents = 2.0 * block_indices / d_k
    inv_freq = 1.0 / (theta ** exponents)
    angles = positions * inv_freq                                         # (L, D/2)
    return jnp.sin(angles), jnp.cos(angles)


def rope_forward(x, token_positions, sin_buffer, cos_buffer):
    """Pallas-backed RoPE forward.  x: (B, S, D) float, token_positions: (B, S) int."""
    B, S, D = x.shape
    half = D // 2
    assert D == 2 * half, "d_k must be even for RoPE"
    assert sin_buffer.shape[-1] == half and cos_buffer.shape[-1] == half

    # ---- tiny (L, D) lane-expanded / sign-folded tables (exact transforms) ----
    # cos_e[p, 2i] = cos_e[p, 2i+1] = cos[p, i]
    # sin_s[p, 2i] = -sin[p, i] ; sin_s[p, 2i+1] = +sin[p, i]
    cos_e = jnp.repeat(cos_buffer, 2, axis=-1)                            # (L, D)
    sin_e = jnp.repeat(sin_buffer, 2, axis=-1)                            # (L, D)
    sign = jnp.where(jnp.arange(D) % 2 == 0, -1.0, 1.0).astype(sin_e.dtype)
    sin_s = sin_e * sign

    # ---- one-pass per-token gather, in x.dtype (no f32 half-width temps) ----
    pos = token_positions.reshape(-1)                                     # (N,)
    cos_g = cos_e[pos].astype(x.dtype)                                    # (N, D)
    sin_g = sin_s[pos].astype(x.dtype)                                    # (N, D)

    # ---- flatten + fold rows into lanes for a lane-dense (mult-of-128) width ----
    N = B * S
    g = 1
    if D % 128 != 0:
        cand = 128 // math.gcd(D, 128)
        if N % cand == 0:
            g = cand
    R = N // g
    W = g * D
    x2 = x.reshape(R, W)          # contiguous reshapes: metadata only
    cos_g = cos_g.reshape(R, W)
    sin_g = sin_g.reshape(R, W)

    # ---- row tiling: ~1 MiB per block -> ~8 MiB VMEM w/ double buffering ----
    itemsize = jnp.dtype(x.dtype).itemsize
    max_rows = max(8, ((1 << 20) // (W * itemsize)) // 8 * 8)
    tR = R if R <= max_rows else max_rows
    num_tiles = pl.cdiv(R, tR)

    spec = pl.BlockSpec((tR, W), lambda i: (i, 0))
    out2 = pl.pallas_call(
        rope_kernel,
        out_shape=jax.ShapeDtypeStruct((R, W), x.dtype),
        grid=(num_tiles,),
        in_specs=[spec, spec, spec],
        out_specs=spec,
        compiler_params=pltpu.CompilerParams(dimension_semantics=("parallel",)),
    )(x2, cos_g, sin_g)

    return out2.reshape(B, S, D)


def rope_reference(x, token_positions, sin_buffer, cos_buffer):
    """Pure-JAX transcription of the PyTorch forward, for verification."""
    sin = sin_buffer[token_positions, :]
    cos = cos_buffer[token_positions, :]
    x_even = x[..., 0::2]
    x_odd = x[..., 1::2]
    x_rot_even = x_even * cos - x_odd * sin
    x_rot_odd = x_odd * cos + x_even * sin
    out = jnp.zeros_like(x)
    out = out.at[..., 0::2].set(x_rot_even.astype(x.dtype))
    out = out.at[..., 1::2].set(x_rot_odd.astype(x.dtype))
    return out


if __name__ == "__main__":
    theta = 10000.0
    d_k = 32
    max_seq_len = 64
    B, S = 2, 8

    key = jax.random.PRNGKey(0)
    kx, kp = jax.random.split(key)
    x = jax.random.normal(kx, (B, S, d_k), dtype=jnp.float32)
    token_positions = jax.random.randint(kp, (B, S), 0, max_seq_len, dtype=jnp.int32)

    sin_buffer, cos_buffer = make_rope_buffers(theta, d_k, max_seq_len)

    out = rope_forward(x, token_positions, sin_buffer, cos_buffer)
    out = jax.block_until_ready(out)

    ref = rope_reference(x, token_positions, sin_buffer, cos_buffer)
    # Note: if sin/cos are ever kept in bf16 (bf16 x), loosen to ~1e-2.
    np.testing.assert_allclose(np.asarray(out), np.asarray(ref), rtol=1e-6, atol=1e-6)

    print("KERNEL_OK")
</pallas_src>

<mosaic_0001>
module attributes {stable_mosaic.version = 11 : i64} {
  func.func @rope_kernel(%arg0: i32, %arg1: memref<4x128xf32, #tpu.memory_space<vmem>>, %arg2: memref<4x128xf32, #tpu.memory_space<vmem>>, %arg3: memref<4x128xf32, #tpu.memory_space<vmem>>, %arg4: memref<4x128xf32, #tpu.memory_space<vmem>>) attributes {dimension_semantics = [#tpu.dimension_semantics<parallel>], iteration_bounds = array<i64: 1>, scalar_prefetch = 0 : i64, scratch_operands = 0 : i64, tpu.core_type = #tpu.core_type<tc>, window_params = [{transform_indices = @transform_0, window_bounds = array<i64: 4, 128>}, {transform_indices = @transform_1, window_bounds = array<i64: 4, 128>}, {transform_indices = @transform_2, window_bounds = array<i64: 4, 128>}, {transform_indices = @transform_3, window_bounds = array<i64: 4, 128>}]} {
    %c0 = arith.constant 0 : index
    %c0_0 = arith.constant 0 : index
    %0 = vector.load %arg1[%c0, %c0_0] : memref<4x128xf32, #tpu.memory_space<vmem>>, vector<4x128xf32>
    %c0_1 = arith.constant 0 : index
    %c0_2 = arith.constant 0 : index
    %1 = vector.load %arg2[%c0_1, %c0_2] : memref<4x128xf32, #tpu.memory_space<vmem>>, vector<4x128xf32>
    %c0_3 = arith.constant 0 : index
    %c0_4 = arith.constant 0 : index
    %2 = vector.load %arg3[%c0_3, %c0_4] : memref<4x128xf32, #tpu.memory_space<vmem>>, vector<4x128xf32>
    %3 = tpu.iota {dimensions = array<i32: 1>} : vector<4x128xi32>
    %c1_i32 = arith.constant 1 : i32
    %4 = vector.broadcast %c1_i32 : i32 to vector<4x128xi32>
    %5 = arith.andi %3, %4 : vector<4x128xi32>
    %c0_i32 = arith.constant 0 : i32
    %6 = vector.broadcast %c0_i32 : i32 to vector<4x128xi32>
    %7 = arith.cmpi eq, %5, %6 : vector<4x128xi32>
    %c127_i32 = arith.constant 127 : i32
    %8 = tpu.dynamic_rotate %0 by %c127_i32 dim 1 : vector<4x128xf32>, i32 -> vector<4x128xf32>
    %c1_i32_5 = arith.constant 1 : i32
    %9 = tpu.dynamic_rotate %0 by %c1_i32_5 dim 1 : vector<4x128xf32>, i32 -> vector<4x128xf32>
    %10 = arith.select %7, %8, %9 : vector<4x128xi1>, vector<4x128xf32>
    %11 = arith.mulf %0, %1 : vector<4x128xf32>
    %12 = arith.mulf %10, %2 : vector<4x128xf32>
    %13 = arith.addf %11, %12 : vector<4x128xf32>
    %c0_6 = arith.constant 0 : index
    %c0_7 = arith.constant 0 : index
    %14 = vector.load %arg4[%c0_6, %c0_7] : memref<4x128xf32, #tpu.memory_space<vmem>>, vector<4x128xf32>
    tpu.vector_store %arg4[%c0_6, %c0_7], %13 {strides = array<i32>} : memref<4x128xf32, #tpu.memory_space<vmem>>, vector<4x128xf32>,
    return
  }
  func.func @transform_0(%arg0: i32) -> (i32, i32) {
    %c0_i32 = arith.constant 0 : i32
    %c0_i32_0 = arith.constant 0 : i32
    return %arg0, %c0_i32 : i32, i32
  }
  func.func @transform_1(%arg0: i32) -> (i32, i32) {
    %c0_i32 = arith.constant 0 : i32
    %c0_i32_0 = arith.constant 0 : i32
    return %arg0, %c0_i32 : i32, i32
  }
  func.func @transform_2(%arg0: i32) -> (i32, i32) {
    %c0_i32 = arith.constant 0 : i32
    %c0_i32_0 = arith.constant 0 : i32
    return %arg0, %c0_i32 : i32, i32
  }
  func.func @transform_3(%arg0: i32) -> (i32, i32) {
    %c0_i32 = arith.constant 0 : i32
    %c0_i32_0 = arith.constant 0 : i32
    return %arg0, %c0_i32 : i32, i32
  }
}

</mosaic_0001>

<bundles_post_ra>
// kernel: tpu_custom_call.1
= control target key start
LH: loop header
LB: loop body
LE: loop exit
PB: predicated region body
PF: predicated region fallthrough
CT: control target
= control target key end

     0   :  { %8 = vsyncpa [#allocation3], 0  ;;  %s212_s0 = inlined_call_operand.hbm [shape: f32[4,128], index: 0, kind: input, shape index: {}]   ;;  %s213_s1 = inlined_call_operand.hbm [shape: f32[4,128], index: 1, kind: input, shape index: {}]   ;;  %s214_s2 = inlined_call_operand.vmem [shape: f32[4,128], index: 2, kind: input, shape index: {}]   ;;  %s215_s3 = inlined_call_operand.hbm [shape: f32[4,128], index: 3, kind: output, shape index: {}]  }
   0x1   :  { %9 = vsyncpa [#allocation6], 0 }
   0x2   :  { %10 = vsyncpa [#allocation4], 0  ;;  %s148_s12 = smov [#allocation2]   ;;  %s149_s14 = smov [#allocation5]  }
   0x3   :  { %s17_s13 = sshll.u32 %s148_s12, 4  ;;  %s27_s15 = sshll.u32 %s149_s14, 4  ;;  %s18_s13 = int_to_ptr.vmem [resolvable:$true] %s17_s13  ;;  %s28_s15 = int_to_ptr.vmem [resolvable:$true] %s27_s15 }
   0x4   :  { %s76_s18 = scalar_lea.hbm %s212_s0, 64 }
   0x5   :  { %p77_p0 = scmp.ne.s32.totalorder %s212_s0, %s76_s18  ;;  %p80_p1 = scmp.lt.u32.totalorder %s76_s18, %s212_s0 }
   0x7   :  { %p82_p2 = pnand %p80_p1, %p77_p0 }
   0x9   :  { %85 = shalt.err (!%p82_p2)
}
   0xa   :  { %s86_s23 = scalar_lea.vmem %s18_s13, 64  ;;  %p91_p4 = scmp.lt.s32.totalorder %s18_s13, %s18_s13 }
   0xb   :  { %p87_p3 = scmp.ne.s32.totalorder %s18_s13, %s86_s23  ;;  %p92_p5 = scmp.lt.s32.totalorder %s86_s23, %s86_s23 }
   0xd   :  { %p93_p6 = por %p92_p5, %p91_p4 }
   0xf   :  { %p94_p7 = pnand %p93_p6, %p87_p3 }
  0x11   :  { %97 = shalt.err (!%p94_p7)
}
  0x12   :  { %20 = dma.hbm_to_vmem [thread:$0]  %s212_s0, 64, %s18_s13, [#allocation3]  }
  0x13   :  { %s98_s28 = scalar_lea.hbm %s213_s1, 64 }
  0x14   :  { %p99_p8 = scmp.ne.s32.totalorder %s213_s1, %s98_s28  ;;  %p102_p9 = scmp.lt.u32.totalorder %s98_s28, %s213_s1 }
  0x16   :  { %p104_p10 = pnand %p102_p9, %p99_p8 }
  0x18   :  { %107 = shalt.err (!%p104_p10)
}
  0x19   :  { %s108_s6 = scalar_lea.vmem %s28_s15, 64  ;;  %p113_p12 = scmp.lt.s32.totalorder %s28_s15, %s28_s15 }
  0x1a   :  { %p109_p11 = scmp.ne.s32.totalorder %s28_s15, %s108_s6  ;;  %p114_p13 = scmp.lt.s32.totalorder %s108_s6, %s108_s6 }
  0x1c   :  { %p115_p0 = por %p114_p13, %p113_p12 }
  0x1e   :  { %p116_p1 = pnand %p115_p0, %p109_p11 }
  0x20   :  { %119 = shalt.err (!%p116_p1)
}
  0x21   :  { %30 = dma.hbm_to_vmem [thread:$0]  %s213_s1, 64, %s28_s15, [#allocation6]  }
  0x22   :  { %142 = dma.done.wait [#allocation3], 64  }
  0x23   :  { %143 = vsyncadd [#allocation3], 4294967232 }
  0x24   :  { %144 = dma.done.wait [#allocation6], 64  }
  0x25   :  { %145 = vsyncadd [#allocation6], 4294967232  ;;  %v39_v0 = vld [vmem:[#allocation2] sm:$0xf]  ;;  %s150_s8 = smov 127   ;;  %s151_s9 = smov 1   ;;  %v42_v1 = vlaneseq }
  0x26   :  { %46 = vrot.lane.b32.xlu0 %v39_v0, %s150_s8  ;;  %v40_v5 = vld [vmem:[#allocation5] sm:$0xf]  ;;  %v41_v6 = vld [vmem:[%s214_s2] sm:$0xf]  ;;  %s152_s1 = smov [#allocation7]  }
  0x27   :  { %v43_v2 = vand.u32 127, %v42_v1  ;;  %v51_v7 = vmul.f32 %v40_v5, %v39_v0  ;;  %s61_s12 = sshll.u32 %s152_s1, 4  ;;  %s62_s12 = int_to_ptr.vmem [resolvable:$true] %s61_s12 }
  0x28   :  { %s120_s13 = scalar_lea.vmem %s62_s12, 64  ;;  %p125_p3 = scmp.lt.s32.totalorder %s62_s12, %s62_s12 }
  0x29   :  { %v44_v3 = vand.u32 1, %v43_v2  ;;  %p121_p2 = scmp.ne.s32.totalorder %s62_s12, %s120_s13  ;;  %p126_p4 = scmp.lt.s32.totalorder %s120_s13, %s120_s13 }
  0x2a   :  { %48 = vrot.lane.b32.xlu0 %v39_v0, %s151_s9 }
  0x2b   :  { %vm45_vm0 = vcmp.eq.s32.totalorder %v44_v3, 0  ;;  %p127_p5 = por %p126_p4, %p125_p3 }
  0x2d   :  { %p128_p6 = pnand %p127_p5, %p121_p2 }
  0x98   :  { %v47_v4 = vpop.permute.xlu0 %46 }
  0x9c   :  { %v49_v8 = vpop.permute.xlu0 %48 }
  0x9d   :  { %v50_v9 = vsel %vm45_vm0, %v47_v4, %v49_v8 }
  0x9e   :  { %v52_v10 = vmul.f32 %v50_v9, %v41_v6 }
  0xa0   :  { %v53_v11 = vadd.f32 %v52_v10, %v51_v7 }
  0xa2   :  { %54 = vst [vmem:[#allocation7] sm:$0xf] %v53_v11 }
  0xa3   :  { %131 = shalt.err (!%p128_p6)
}
  0xa4   :  { %s132_s2 = scalar_lea.hbm %s215_s3, 64 }
  0xa5   :  { %p133_p7 = scmp.ne.s32.totalorder %s215_s3, %s132_s2  ;;  %p136_p8 = scmp.lt.u32.totalorder %s132_s2, %s215_s3 }
  0xa7   :  { %p138_p9 = pnand %p136_p8, %p133_p7 }
  0xa9   :  { %141 = shalt.err (!%p138_p9)
}
  0xaa   :  { %64 = dma.vmem_to_hbm [thread:$0]  %s62_s12, 64, %s215_s3, [#allocation4]  }
  0xab   :  { %146 = dma.done.wait [#allocation4], 64  }
  0xac   :  { %147 = vsyncadd [#allocation4], 4294967232 }
  0xad   :  { %68 = vsyncpa [#allocation3], 1 }
  0xae   :  { %69 = vsyncpa [#allocation6], 1 }
  0xaf   :  { %70 = vsyncpa [#allocation4], 1 }

</bundles_post_ra>
